<compile_context>
chip_gen: v5e
topology: v5e:2x2
jax: 0.10.0
libtpu: 0.0.40
codegen_flags: <defaults>
</compile_context>

<pallas_src>
import jax
import jax.numpy as jnp
from jax.experimental import pallas as pl
from jax.experimental.pallas import tpu as pltpu

C_IN = 576
C_MID = 144


def _se_kernel(x_ref, w1_ref, w2_ref, b_ref, o_ref):
    # x_ref:  (M, C_IN)       f32
    # w1_ref: (C_IN, C_MID)   bf16  (storage dtype only; math in f32)
    # w2_ref: (C_MID, C_IN)   bf16
    # b_ref:  (2, C_IN)       f32   row 0[:C_MID] = b1, row 1 = b2
    # o_ref:  (M, C_IN)       f32
    x = x_ref[...]                                    # stays f32 (no lhs cast)
    w1 = w1_ref[...].astype(jnp.float32)              # upcast in VMEM (cheap)
    w2 = w2_ref[...].astype(jnp.float32)
    b1 = b_ref[0:1, 0:C_MID]                          # (1, C_MID)
    b2 = b_ref[1:2, :]                                # (1, C_IN)

    h = jnp.dot(x, w1, preferred_element_type=jnp.float32) + b1
    h = jnp.maximum(h, 0.0)                           # ReLU (f32, VPU)
    y = jnp.dot(h, w2, preferred_element_type=jnp.float32) + b2
    o_ref[...] = jax.nn.sigmoid(y).astype(o_ref.dtype)  # Sigmoid (f32, EUP)


def se_block(x_nchw, w1_bf16, w2_bf16, b_packed):
    """x_nchw: (N, 576, 1, 1) float32. Returns (N, 576, 1, 1) float32."""
    n, c, h, w = x_nchw.shape
    assert c == C_IN and h == 1 and w == 1
    m = n * h * w
    x2d = x_nchw.reshape(m, C_IN)          # 1x1 spatial -> plain (M, C) matmul

    vmem = pl.BlockSpec(memory_space=pltpu.MemorySpace.VMEM)

    flops = 2 * m * (C_IN * C_MID + C_MID * C_IN)
    bytes_accessed = (
        2 * C_IN * C_MID * 2               # two bf16 weight matrices (dominant)
        + 2 * C_IN * 4                     # packed f32 biases
        + 2 * m * C_IN * 4                 # f32 activation in + out
    )

    out2d = pl.pallas_call(
        _se_kernel,
        out_shape=jax.ShapeDtypeStruct((m, C_IN), jnp.float32),
        in_specs=[vmem, vmem, vmem, vmem],
        out_specs=vmem,
        cost_estimate=pl.CostEstimate(
            flops=flops,
            transcendentals=m * C_IN,      # sigmoid
            bytes_accessed=bytes_accessed,
        ),
    )(x2d, w1_bf16, w2_bf16, b_packed)

    return out2d.reshape(n, C_IN, 1, 1)


def pack_biases(b1, b2):
    """Pack b1 (C_MID,) and b2 (C_IN,) into one (2, C_IN) f32 operand."""
    b = jnp.zeros((2, C_IN), jnp.float32)
    b = b.at[0, :C_MID].set(b1.astype(jnp.float32))
    b = b.at[1, :].set(b2.astype(jnp.float32))
    return b


def init_params(key):
    """PyTorch-like Conv2d init (1x1 kernels), weights pre-transposed to (Cin, Cout).

    Returns f32 master weights; the caller casts weight storage to bf16 for the
    kernel (HBM-traffic optimization). Biases stay f32.
    """
    k1, k2, k3, k4 = jax.random.split(key, 4)
    bound1 = 1.0 / jnp.sqrt(float(C_IN))
    bound2 = 1.0 / jnp.sqrt(float(C_MID))
    w1 = jax.random.uniform(k1, (C_IN, C_MID), jnp.float32, -bound1, bound1)
    b1 = jax.random.uniform(k2, (C_MID,), jnp.float32, -bound1, bound1)
    w2 = jax.random.uniform(k3, (C_MID, C_IN), jnp.float32, -bound2, bound2)
    b2 = jax.random.uniform(k4, (C_IN,), jnp.float32, -bound2, bound2)
    return w1, b1, w2, b2


if __name__ == "__main__":
    key = jax.random.PRNGKey(0)
    kx, kp = jax.random.split(key)

    # Input consistent with the module's forward: [1, 576, 1, 1] NCHW
    x = jax.random.normal(kx, (1, C_IN, 1, 1), dtype=jnp.float32)
    w1_f32, b1, w2_f32, b2 = init_params(kp)
    w1_bf16 = w1_f32.astype(jnp.bfloat16)   # bf16 HBM storage (bandwidth win)
    w2_bf16 = w2_f32.astype(jnp.bfloat16)
    b_packed = pack_biases(b1, b2)

    out = se_block(x, w1_bf16, w2_bf16, b_packed)
    out = jax.block_until_ready(out)
    assert out.shape == (1, C_IN, 1, 1)

    x2d = x.reshape(1, C_IN)

    # Reference 1: f32 math with the same bf16-quantized weights (tight tol —
    # the kernel now does all math in f32, only weight storage is bf16).
    w1_q = w1_bf16.astype(jnp.float32)
    w2_q = w2_bf16.astype(jnp.float32)
    ref_q = jax.nn.sigmoid(
        jnp.maximum(x2d @ w1_q + b1, 0.0) @ w2_q + b2
    ).reshape(1, C_IN, 1, 1)
    assert jnp.allclose(out, ref_q, atol=1e-4, rtol=1e-4)

    # Reference 2: full-f32 module semantics (f32 master weights); loose tol
    # only covers the bf16 weight-storage quantization.
    ref_f32 = jax.nn.sigmoid(
        jnp.maximum(x2d @ w1_f32 + b1, 0.0) @ w2_f32 + b2
    ).reshape(1, C_IN, 1, 1)
    assert jnp.allclose(out, ref_f32, atol=2e-2, rtol=2e-2)

    print("KERNEL_OK")
</pallas_src>

<mosaic_0001>
module attributes {stable_mosaic.version = 11 : i64} {
  func.func @_se_kernel(%arg0: memref<1x576xf32, #tpu.memory_space<vmem>>, %arg1: memref<576x144xbf16, #tpu.memory_space<vmem>>, %arg2: memref<144x576xbf16, #tpu.memory_space<vmem>>, %arg3: memref<2x576xf32, #tpu.memory_space<vmem>>, %arg4: memref<1x576xf32, #tpu.memory_space<vmem>>) attributes {dimension_semantics = [], scalar_prefetch = 0 : i64, scratch_operands = 0 : i64, tpu.core_type = #tpu.core_type<tc>} {
    %c0 = arith.constant 0 : index
    %c0_0 = arith.constant 0 : index
    %0 = vector.load %arg0[%c0, %c0_0] : memref<1x576xf32, #tpu.memory_space<vmem>>, vector<1x576xf32>
    %c0_1 = arith.constant 0 : index
    %c0_2 = arith.constant 0 : index
    %1 = vector.load %arg1[%c0_1, %c0_2] : memref<576x144xbf16, #tpu.memory_space<vmem>>, vector<576x144xbf16>
    %2 = arith.extf %1 : vector<576x144xbf16> to vector<576x144xf32>
    %c0_3 = arith.constant 0 : index
    %c0_4 = arith.constant 0 : index
    %3 = vector.load %arg2[%c0_3, %c0_4] : memref<144x576xbf16, #tpu.memory_space<vmem>>, vector<144x576xbf16>
    %4 = arith.extf %3 : vector<144x576xbf16> to vector<144x576xf32>
    %c0_5 = arith.constant 0 : index
    %c0_6 = arith.constant 0 : index
    %5 = vector.load %arg3[%c0_5, %c0_6] : memref<2x576xf32, #tpu.memory_space<vmem>>, vector<1x144xf32>
    %c1 = arith.constant 1 : index
    %c0_7 = arith.constant 0 : index
    %6 = vector.load %arg3[%c1, %c0_7] : memref<2x576xf32, #tpu.memory_space<vmem>>, vector<1x576xf32>
    %cst = arith.constant dense<0.000000e+00> : vector<1x144xf32>
    %7 = tpu.matmul %0, %2, %cst {dimension_numbers = #tpu.dot_dimension_numbers<[1], [0], [0], [1], [0, 0, 1, 1], [], []>} : vector<1x576xf32>, vector<576x144xf32>, vector<1x144xf32> -> vector<1x144xf32>
    %8 = arith.addf %7, %5 : vector<1x144xf32>
    %cst_8 = arith.constant 0.000000e+00 : f32
    %9 = vector.broadcast %cst_8 : f32 to vector<1x144xf32>
    %10 = arith.maximumf %8, %9 : vector<1x144xf32>
    %cst_9 = arith.constant dense<0.000000e+00> : vector<1x576xf32>
    %11 = tpu.matmul %10, %4, %cst_9 {dimension_numbers = #tpu.dot_dimension_numbers<[1], [0], [0], [1], [0, 0, 1, 1], [], []>} : vector<1x144xf32>, vector<144x576xf32>, vector<1x576xf32> -> vector<1x576xf32>
    %12 = arith.addf %11, %6 : vector<1x576xf32>
    %13 = arith.negf %12 : vector<1x576xf32>
    %14 = math.exp %13 : vector<1x576xf32>
    %cst_10 = arith.constant 1.000000e+00 : f32
    %15 = vector.broadcast %cst_10 : f32 to vector<1x576xf32>
    %16 = arith.addf %15, %14 : vector<1x576xf32>
    %17 = arith.divf %15, %16 : vector<1x576xf32>
    %c0_11 = arith.constant 0 : index
    %c0_12 = arith.constant 0 : index
    %18 = vector.load %arg4[%c0_11, %c0_12] : memref<1x576xf32, #tpu.memory_space<vmem>>, vector<1x576xf32>
    tpu.vector_store %arg4[%c0_11, %c0_12], %17 {strides = array<i32>} : memref<1x576xf32, #tpu.memory_space<vmem>>, vector<1x576xf32>,
    return
  }
}

</mosaic_0001>

<bundles_post_ra>
// kernel: tpu_custom_call.1
= control target key start
LH: loop header
LB: loop body
LE: loop exit
PB: predicated region body
PF: predicated region fallthrough
CT: control target
= control target key end

     0   :  { %s1980_s0 = inlined_call_operand.vmem [shape: f32[1,576], index: 0, kind: input, shape index: {}]   ;;  %s1981_s1 = inlined_call_operand.vmem [shape: bf16[576,144], index: 1, kind: input, shape index: {}]   ;;  %s1982_s2 = inlined_call_operand.vmem [shape: bf16[144,576], index: 2, kind: input, shape index: {}]   ;;  %s1983_s3 = inlined_call_operand.vmem [shape: f32[2,576], index: 3, kind: input, shape index: {}]   ;;  %s1984_s4 = inlined_call_operand.hbm [shape: f32[1,576], index: 4, kind: output, shape index: {}]  }
   0x1   :  { %v1040_v0 = vld [vmem:[%s1981_s1 + $0x78] sm:$0xff]  ;;  %v1045_v1 = vld [vmem:[%s1981_s1 + $0x70] sm:$0xff]  ;;  %v1058_v6 = vld [vmem:[%s1981_s1 + $0x68] sm:$0xff] }
   0x2   :  { %v1050_v2 = vld [vmem:[%s1981_s1 + $0xf8] sm:$0xff]  ;;  %v121_v3 = vunpack.c.l.bf16 %v1040_v0  ;;  %v119_v4 = vunpack.c.l.bf16 %v1045_v1  ;;  %v1063_v7 = vld [vmem:[%s1981_s1 + $0xf0] sm:$0xff]  ;;  %v1075_v11 = vld [vmem:[%s1981_s1 + $0x60] sm:$0xff]  ;;  %v117_v14 = vunpack.c.l.bf16 %v1058_v6 }
   0x3   :  { %v153_v5 = vunpack.c.l.bf16 %v1050_v2  ;;  %v1068_v8 = vld [vmem:[%s1981_s1 + $0x178] sm:$0xff]  ;;  %v151_v9 = vunpack.c.l.bf16 %v1063_v7  ;;  %v1080_v12 = vld [vmem:[%s1981_s1 + $0xe8] sm:$0xff]  ;;  %v1085_v13 = vld [vmem:[%s1981_s1 + $0x170] sm:$0xff]  ;;  %v115_v23 = vunpack.c.l.bf16 %v1075_v11 }
   0x4   :  { %v185_v10 = vunpack.c.l.bf16 %v1068_v8  ;;  %400 = vmatpush.msra.mxu0 %v121_v3  ;;  %v149_v15 = vunpack.c.l.bf16 %v1080_v12  ;;  %v183_v16 = vunpack.c.l.bf16 %v1085_v13  ;;  %v1093_v17 = vld [vmem:[%s1981_s1 + $0x1f8] sm:$0xff]  ;;  %v1098_v18 = vld [vmem:[%s1981_s1 + $0xe0] sm:$0xff]  ;;  %v1109_v21 = vld [vmem:[%s1981_s1 + $0x168] sm:$0xff] }
   0x5   :  { %420 = vmatpush.msra.mxu1 %v153_v5  ;;  %v217_v19 = vunpack.c.l.bf16 %v1093_v17  ;;  %v1104_v20 = vld [vmem:[%s1981_s1 + $0x58] sm:$0xff]  ;;  %v1114_v22 = vld [vmem:[%s1981_s1 + $0x1f0] sm:$0xff]  ;;  %v147_v24 = vunpack.c.l.bf16 %v1098_v18  ;;  %v181_v25 = vunpack.c.l.bf16 %v1109_v21  ;;  %v1128_v28 = vld [vmem:[%s1981_s1 + $0x160] sm:$0xff] }
   0x6   :  { %440 = vmatpush.msra.mxu2 %v185_v10  ;;  %401 = vmatpush.msra.mxu0 %v119_v4  ;;  %v215_v26 = vunpack.c.l.bf16 %v1114_v22  ;;  %v1123_v27 = vld [vmem:[%s1981_s1 + $0xd8] sm:$0xff]  ;;  %v1133_v29 = vld [vmem:[%s1981_s1 + $0x1e8] sm:$0xff]  ;;  %v1138_v30 = vld [vmem:[%s1981_s1 + $0x50] sm:$0xff]  ;;  %v179_v31 = vunpack.c.l.bf16 %v1128_v28  ;;  %v113_v35 = vunpack.c.l.bf16 %v1104_v20 }
   0x7   :  { %421 = vmatpush.msra.mxu1 %v151_v9  ;;  %460 = vmatpush.msra.mxu3 %v217_v19  ;;  %v213_v32 = vunpack.c.l.bf16 %v1133_v29  ;;  %v1145_v33 = vld [vmem:[%s1981_s1 + $0xd0] sm:$0xff]  ;;  %v1150_v34 = vld [vmem:[%s1981_s1 + $0x158] sm:$0xff]  ;;  %v145_v36 = vunpack.c.l.bf16 %v1123_v27  ;;  %v1157_v37 = vld [vmem:[%s1981_s1 + $0x48] sm:$0xff]  ;;  %v111_v44 = vunpack.c.l.bf16 %v1138_v30 }
   0x8   :  { %441 = vmatpush.msra.mxu2 %v183_v16  ;;  %402 = vmatpush.msra.mxu0 %v117_v14  ;;  %v1162_v38 = vld [vmem:[%s1981_s1 + $0x1e0] sm:$0xff]  ;;  %v177_v39 = vunpack.c.l.bf16 %v1150_v34  ;;  %v1169_v41 = vld [vmem:[%s1981_s1 + $0xc8] sm:$0xff]  ;;  %v1174_v42 = vld [vmem:[%s1981_s1 + $0x150] sm:$0xff]  ;;  %v143_v45 = vunpack.c.l.bf16 %v1145_v33  ;;  %v109_v52 = vunpack.c.l.bf16 %v1157_v37 }
   0x9   :  { %422 = vmatpush.msra.mxu1 %v149_v15  ;;  %461 = vmatpush.msra.mxu3 %v215_v26  ;;  %v211_v40 = vunpack.c.l.bf16 %v1162_v38  ;;  %v1179_v43 = vld [vmem:[%s1981_s1 + $0x1d8] sm:$0xff]  ;;  %v1186_v46 = vld [vmem:[%s1981_s1 + $0x148] sm:$0xff]  ;;  %v1191_v47 = vld [vmem:[%s1981_s1 + $0x1d0] sm:$0xff]  ;;  %v175_v49 = vunpack.c.l.bf16 %v1174_v42  ;;  %v141_v53 = vunpack.c.l.bf16 %v1169_v41 }
   0xa   :  { %442 = vmatpush.msra.mxu2 %v181_v25  ;;  %403 = vmatpush.msra.mxu0 %v115_v23  ;;  %v1196_v48 = vld [vmem:[%s1981_s1 + $0x40] sm:$0xff]  ;;  %v209_v50 = vunpack.c.l.bf16 %v1179_v43  ;;  %v1215_v55 = vld [vmem:[%s1981_s1 + $0x1c8] sm:$0xff]  ;;  %v1220_v56 = vld [vmem:[%s1981_s1 + $0x38] sm:$0xff]  ;;  %v173_v57 = vunpack.c.l.bf16 %v1186_v46  ;;  %v207_v58 = vunpack.c.l.bf16 %v1191_v47 }
   0xb   :  { %423 = vmatpush.msra.mxu1 %v147_v24  ;;  %462 = vmatpush.msra.mxu3 %v213_v32  ;;  %v1203_v51 = vld [vmem:[%s1981_s1 + $0xc0] sm:$0xff]  ;;  %v1227_v59 = vld [vmem:[%s1981_s1 + $0xb8] sm:$0xff]  ;;  %v107_v60 = vunpack.c.l.bf16 %v1196_v48  ;;  %v1244_v3 = vld [vmem:[%s1981_s1 + $0x30] sm:$0xff]  ;;  %v205_v5 = vunpack.c.l.bf16 %v1215_v55  ;;  %v105_v10 = vunpack.c.l.bf16 %v1220_v56 }
   0xc   :  { %443 = vmatpush.msra.mxu2 %v179_v31  ;;  %404 = vmatpush.msra.mxu0 %v113_v35  ;;  %v1210_v54 = vld [vmem:[%s1981_s1 + $0x140] sm:$0xff]  ;;  %v139_v61 = vunpack.c.l.bf16 %v1203_v51  ;;  %v1234_v62 = vld [vmem:[%s1981_s1 + $0x138] sm:$0xff]  ;;  %v1251_v9 = vld [vmem:[%s1981_s1 + $0xb0] sm:$0xff]  ;;  %v137_v14 = vunpack.c.l.bf16 %v1227_v59  ;;  %v103_v26 = vunpack.c.l.bf16 %v1244_v3 }
   0xd   :  { %424 = vmatpush.msra.mxu1 %v145_v36  ;;  %463 = vmatpush.msra.mxu3 %v211_v40  ;;  %v1239_v63 = vld [vmem:[%s1981_s1 + $0x1c0] sm:$0xff]  ;;  %v171_v4 = vunpack.c.l.bf16 %v1210_v54  ;;  %v1258_v15 = vld [vmem:[%s1981_s1 + $0x130] sm:$0xff]  ;;  %v1263_v16 = vld [vmem:[%s1981_s1 + $0x1b8] sm:$0xff]  ;;  %v169_v23 = vunpack.c.l.bf16 %v1234_v62  ;;  %v135_v31 = vunpack.c.l.bf16 %v1251_v9 }
   0xe   :  { %444 = vmatpush.msra.mxu2 %v177_v39  ;;  %405 = vmatpush.msra.mxu0 %v111_v44  ;;  %2001 = vst [vmem:[#allocation5_spill] sm:$0xff] %v1239_v63  ;;  %v1268_v19 = vld [vmem:[%s1981_s1 + $0x28] sm:$0xff]  ;;  %v203_v24 = vunpack.c.l.bf16 %v1239_v63  ;;  %v1287_v35 = vld [vmem:[%s1981_s1 + $0x1b0] sm:$0xff]  ;;  %v1292_v36 = vld [vmem:[%s1981_s1 + $0x20] sm:$0xff]  ;;  %v167_v39 = vunpack.c.l.bf16 %v1258_v15  ;;  %v201_v40 = vunpack.c.l.bf16 %v1263_v16 }
   0xf   :  { %425 = vmatpush.msra.mxu1 %v143_v45  ;;  %464 = vmatpush.msra.mxu3 %v209_v50  ;;  %2002 = vst [vmem:[#allocation6_spill] sm:$0xff] %v1263_v16  ;;  %v1275_v25 = vld [vmem:[%s1981_s1 + $0xa8] sm:$0xff]  ;;  %v1299_v44 = vld [vmem:[%s1981_s1 + $0xa0] sm:$0xff]  ;;  %v101_v45 = vunpack.c.l.bf16 %v1268_v19 }
  0x10   :  { %445 = vmatpush.msra.mxu2 %v175_v49  ;;  %406 = vmatpush.msra.mxu0 %v109_v52  ;;  %v1282_v32 = vld [vmem:[%s1981_s1 + $0x128] sm:$0xff]  ;;  %2003 = vst [vmem:[#allocation7_spill] sm:$0xff] %v1287_v35  ;;  %v133_v49 = vunpack.c.l.bf16 %v1275_v25  ;;  %v1306_v50 = vld [vmem:[%s1981_s1 + $0x120] sm:$0xff] }
  0x11   :  { %426 = vmatpush.msra.mxu1 %v141_v53  ;;  %465 = vmatpush.msra.mxu3 %v207_v58  ;;  %2004 = vst [vmem:[#allocation8_spill] sm:$0xff] %v1306_v50  ;;  %v1311_v52 = vld [vmem:[%s1981_s1 + $0x1a8] sm:$0xff]  ;;  %v1316_v53 = vld [vmem:[%s1981_s1 + $0x18] sm:$0xff]  ;;  %v199_v58 = vunpack.c.l.bf16 %v1287_v35 }
  0x12   :  { %446 = vmatpush.msra.mxu2 %v173_v57  ;;  %407 = vmatpush.msra.mxu0 %v107_v60  ;;  %2005 = vst [vmem:[#allocation9_spill] sm:$0xff] %v1311_v52  ;;  %v165_v57 = vunpack.c.l.bf16 %v1282_v32  ;;  %v1323_v60 = vld [vmem:[%s1981_s1 + $0x98] sm:$0xff]  ;;  %v1371_v16 = vld [vmem:[%s1981_s1 + $0x88] sm:$0xff] }
  0x13   :  { %427 = vmatpush.msra.mxu1 %v139_v61  ;;  %466 = vmatpush.msra.mxu3 %v205_v5  ;;  %v99_v61 = vunpack.c.l.bf16 %v1292_v36  ;;  %v1330_v5 = vld [vmem:[%s1981_s1 + $0x118] sm:$0xff]  ;;  %2011 = vst [vmem:[#allocation15_spill] sm:$0xff] %v1371_v16 }
  0x14   :  { %447 = vmatpush.msra.mxu2 %v171_v4  ;;  %408 = vmatpush.msra.mxu0 %v105_v10  ;;  %v131_v4 = vunpack.c.l.bf16 %v1299_v44  ;;  %2006 = vst [vmem:[#allocation10_spill] sm:$0xff] %v1330_v5  ;;  %v1335_v10 = vld [vmem:[%s1981_s1 + $0x1a0] sm:$0xff] }
  0x15   :  { %428 = vmatpush.msra.mxu1 %v137_v14  ;;  %467 = vmatpush.msra.mxu3 %v203_v24  ;;  %2007 = vst [vmem:[#allocation11_spill] sm:$0xff] %v1335_v10  ;;  %v1340_v14 = vld [vmem:[%s1981_s1 + $0x10] sm:$0xff]  ;;  %v197_v24 = vunpack.c.l.bf16 %v1311_v52  ;;  %v1359_v52 = vld [vmem:[%s1981_s1 + $0x198] sm:$0xff]  ;;  %v195_v35 = vunpack.c.l.bf16 %v1335_v10 }
  0x16   :  { %448 = vmatpush.msra.mxu2 %v169_v23  ;;  %409 = vmatpush.msra.mxu0 %v103_v26  ;;  %v163_v23 = vunpack.c.l.bf16 %v1306_v50  ;;  %v1347_v26 = vld [vmem:[%s1981_s1 + $0x90] sm:$0xff]  ;;  %2010 = vst [vmem:[#allocation14_spill] sm:$0xff] %v1359_v52 }
  0x17   :  { %429 = vmatpush.msra.mxu1 %v135_v31  ;;  %468 = vmatpush.msra.mxu3 %v201_v40  ;;  %2008 = vst [vmem:[#allocation12_spill] sm:$0xff] %v1347_v26  ;;  %v97_v31 = vunpack.c.l.bf16 %v1316_v53  ;;  %v1354_v40 = vld [vmem:[%s1981_s1 + $0x110] sm:$0xff] }
  0x18   :  { %449 = vmatpush.msra.mxu2 %v167_v39  ;;  %410 = vmatpush.msra.mxu0 %v101_v45  ;;  %v129_v39 = vunpack.c.l.bf16 %v1323_v60  ;;  %2009 = vst [vmem:[#allocation13_spill] sm:$0xff] %v1354_v40  ;;  %v1364_v45 = vld [vmem:[%s1981_s1 + $0x8] sm:$0xff] }
  0x19   :  { %430 = vmatpush.msra.mxu1 %v133_v49  ;;  %469 = vmatpush.msra.mxu3 %v199_v58  ;;  %v161_v49 = vunpack.c.l.bf16 %v1330_v5 }
  0x1a   :  { %450 = vmatpush.msra.mxu2 %v165_v57 }
  0x1b   :  { %9 = vsyncpa [#allocation3], 0  ;;  %411 = vmatpush.msra.mxu0 %v99_v61  ;;  %431 = vmatpush.msra.mxu1 %v131_v4  ;;  %v95_v57 = vunpack.c.l.bf16 %v1340_v14  ;;  %v127_v58 = vunpack.c.l.bf16 %v1347_v26  ;;  %v1378_v63 = vld [vmem:[%s1981_s1 + $0x108] sm:$0xff]  ;;  %v1383_v10 = vld [vmem:[%s1981_s1 + $0x190] sm:$0xff]  ;;  %v159_v4 = vunpack.c.l.bf16 %v1354_v40  ;;  %v193_v5 = vunpack.c.l.bf16 %v1359_v52  ;;  %s942_s5 = sshll.u32 %s1984_s4, 4  ;;  %s943_s5 = int_to_ptr.hbm [resolvable:$true] %s942_s5 }
  0x1c   :  { %2012 = vst [vmem:[#allocation16_spill] sm:$0xff] %v1378_v63  ;;  %451 = vmatpush.msra.mxu2 %v163_v23  ;;  %470 = vmatpush.msra.mxu3 %v197_v24  ;;  %v1388_v61 = vld [vmem:[%s1981_s1] sm:$0xff]  ;;  %v93_v50 = vunpack.c.l.bf16 %v1364_v45  ;;  %v125_v23 = vunpack.c.l.bf16 %v1371_v16  ;;  %v1402_v24 = vld [vmem:[%s1981_s1 + $0x238] sm:$0xff]  ;;  %v157_v52 = vunpack.c.l.bf16 %v1378_v63  ;;  %v191_v40 = vunpack.c.l.bf16 %v1383_v10 }
  0x1d   :  { %2013 = vst [vmem:[#allocation17_spill] sm:$0xff] %v1383_v10  ;;  %v1395_v26 = vld [vmem:[%s1981_s1 + $0x80] sm:$0xff]  ;;  %412 = vmatpush.msra.mxu0 %v97_v31  ;;  %432 = vmatpush.msra.mxu1 %v129_v39  ;;  %v1414_v39 = vld [vmem:[%s1981_s1 + $0x188] sm:$0xff]  ;;  %v91_v16 = vunpack.c.l.bf16 %v1388_v61  ;;  %v233_v10 = vunpack.c.l.bf16 %v1402_v24  ;;  %v122_v63 = vunpack.c.h.bf16 %v1040_v0  ;;  %vm397_vm0 = vcmask 523264  }
  0x1e   :  { %2014 = vst [vmem:[#allocation18_spill] sm:$0xff] %v1395_v26  ;;  %452 = vmatpush.msra.mxu2 %v161_v49  ;;  %471 = vmatpush.msra.mxu3 %v195_v35  ;;  %v1409_v31 = vld [vmem:[%s1981_s1 + $0x100] sm:$0xff]  ;;  %v123_v35 = vunpack.c.l.bf16 %v1395_v26  ;;  %v1421_v49 = vld [vmem:[%s1981_s1 + $0x230] sm:$0xff]  ;;  %v1440_v0 = vld [vmem:[%s1981_s1 + $0x228] sm:$0xff]  ;;  %vm613_vm1 = vcmask 130048  }
  0x1f   :  { %2015 = vst [vmem:[#allocation19_spill] sm:$0xff] %v1402_v24  ;;  %413 = vmatpush.msra.mxu0 %v95_v57  ;;  %433 = vmatpush.msra.mxu1 %v127_v58  ;;  %v1428_v57 = vld [vmem:[%s1980_s0] sm:$0x1f]  ;;  %v155_v26 = vunpack.c.l.bf16 %v1409_v31  ;;  %v120_v24 = vunpack.c.h.bf16 %v1045_v1  ;;  %v118_v1 = vunpack.c.h.bf16 %v1058_v6  ;;  %v186_v6 = vunpack.c.h.bf16 %v1068_v8  ;;  %v1480_v8 = vld [vmem:[%s1981_s1 + $0x208] sm:$0xff] }
  0x20   :  { %2016 = vst [vmem:[#allocation20_spill] sm:$0xff] %v1414_v39  ;;  %453 = vmatpush.msra.mxu2 %v159_v4  ;;  %472 = vmatpush.msra.mxu3 %v193_v5  ;;  %v1433_v58 = vld [vmem:[%s1981_s1 + $0x180] sm:$0xff]  ;;  %v189_v5 = vunpack.c.l.bf16 %v1414_v39  ;;  %v231_v4 = vunpack.c.l.bf16 %v1421_v49 }
  0x21   :  { %414 = vmatpush.msra.mxu0 %v93_v50  ;;  %434 = vmatpush.msra.mxu1 %v125_v23  ;;  %v385_v50 = vperm.slane %v1428_v57, 2  ;;  %v187_v23 = vunpack.c.l.bf16 %v1433_v58  ;;  %v1449_v39 = vld [vmem:[%s1981_s1 + $0x220] sm:$0xff] }
  0x22   :  { %454 = vmatpush.msra.mxu2 %v157_v52  ;;  %473 = vmatpush.msra.mxu3 %v191_v40  ;;  %v229_v52 = vunpack.c.l.bf16 %v1440_v0  ;;  %v154_v40 = vunpack.c.h.bf16 %v1050_v2  ;;  %v152_v2 = vunpack.c.h.bf16 %v1063_v7  ;;  %v150_v7 = vunpack.c.h.bf16 %v1080_v12  ;;  %v1491_v12 = vld [vmem:[%s1981_s1 + $0x200] sm:$0xff] }
  0x23   :  { %415 = vmatpush.msra.mxu0 %v91_v16  ;;  %435 = vmatpush.msra.mxu1 %v123_v35  ;;  %v383_v16 = vperm.slane %v1428_v57, 0  ;;  %v1458_v35 = vld [vmem:[%s1981_s1 + $0x218] sm:$0xff] }
  0x24   :  { %455 = vmatpush.msra.mxu2 %v155_v26  ;;  %474 = vmatpush.msra.mxu3 %v189_v5  ;;  %v1469_v26 = vld [vmem:[%s1981_s1 + $0x210] sm:$0xff]  ;;  %v116_v5 = vunpack.c.h.bf16 %v1075_v11 }
  0x25   :  { %488 = vmatpush.msrb.mxu0 %v233_v10  ;;  %500 = vmatpush.msrb.mxu1 %v122_v63  ;;  %v227_v10 = vunpack.c.l.bf16 %v1449_v39  ;;  %v386_v63 = vperm.slane %v1428_v57, 3  ;;  %v223_v11 = vunpack.c.l.bf16 %v1469_v26 }
  0x26   :  { %456 = vmatmul.f32.vlgmr.msra.gmra.mxu2 %v385_v50  ;;  %475 = vmatpush.msra.mxu3 %v187_v23  ;;  %v184_v23 = vunpack.c.h.bf16 %v1085_v13  ;;  %v112_v13 = vunpack.c.h.bf16 %v1138_v30  ;;  %v178_v30 = vunpack.c.h.bf16 %v1150_v34  ;;  %v174_v34 = vunpack.c.h.bf16 %v1186_v46 }
  0x27   :  { %489 = vmatpush.msrb.mxu0 %v231_v4  ;;  %501 = vmatpush.msrb.mxu1 %v120_v24  ;;  %v225_v24 = vunpack.c.l.bf16 %v1458_v35  ;;  %v384_v4 = vperm.slane %v1428_v57, 1  ;;  %v170_v46 = vunpack.c.h.bf16 %v1234_v62  ;;  %v166_v62 = vunpack.c.h.bf16 %v1282_v32  ;;  %v2019_v32 = vld [vmem:[#allocation12_spill] sm:$0xff] }
  0x28   :  { %520 = vmatpush.msrb.mxu2 %v154_v40  ;;  %416 = vmatmul.f32.vlgmr.msra.gmra.mxu0 %v383_v16  ;;  %v148_v40 = vunpack.c.h.bf16 %v1098_v18  ;;  %v180_v18 = vunpack.c.h.bf16 %v1128_v28  ;;  %v108_v28 = vunpack.c.h.bf16 %v1196_v48  ;;  %v214_v48 = vunpack.c.h.bf16 %v1133_v29 }
  0x29   :  { %490 = vmatpush.msrb.mxu0 %v229_v52  ;;  %502 = vmatpush.msrb.mxu1 %v118_v1  ;;  %v114_v52 = vunpack.c.h.bf16 %v1104_v20  ;;  %v182_v1 = vunpack.c.h.bf16 %v1109_v21  ;;  %v146_v20 = vunpack.c.h.bf16 %v1123_v27  ;;  %v110_v21 = vunpack.c.h.bf16 %v1157_v37 }
  0x2a   :  { %476 = vmatmul.f32.vlgmr.msra.gmra.mxu3 %v386_v63  ;;  %521 = vmatpush.msrb.mxu2 %v152_v2  ;;  %v219_v2 = vunpack.c.l.bf16 %v1491_v12  ;;  %v218_v27 = vunpack.c.h.bf16 %v1093_v17  ;;  %v176_v37 = vunpack.c.h.bf16 %v1174_v42  ;;  %v140_v17 = vunpack.c.h.bf16 %v1203_v51 }
  0x2b   :  { %491 = vmatpush.msrb.mxu0 %v227_v10  ;;  %540 = vmatpush.msrb.mxu3 %v186_v6  ;;  %v221_v10 = vunpack.c.l.bf16 %v1480_v8  ;;  %v387_v6 = vperm.slane %v1428_v57, 4  ;;  %v172_v42 = vunpack.c.h.bf16 %v1210_v54  ;;  %v102_v51 = vunpack.c.h.bf16 %v1268_v19 }
  0x2c   :  { %503 = vmatpush.msrb.mxu1 %v116_v5  ;;  %522 = vmatpush.msrb.mxu2 %v150_v7  ;;  %v142_v5 = vunpack.c.h.bf16 %v1169_v41  ;;  %v216_v7 = vunpack.c.h.bf16 %v1114_v22  ;;  %v104_v41 = vunpack.c.h.bf16 %v1244_v3  ;;  %v138_v22 = vunpack.c.h.bf16 %v1227_v59 }
  0x2d   :  { %492 = vmatpush.msrb.mxu0 %v225_v24  ;;  %436 = vmatmul.f32.vlgmr.msra.gmra.mxu1 %v384_v4  ;;  %v144_v24 = vunpack.c.h.bf16 %v1145_v33  ;;  %v106_v33 = vunpack.c.h.bf16 %v1220_v56  ;;  %v212_v56 = vunpack.c.h.bf16 %v1162_v38  ;;  %v136_v29 = vunpack.c.h.bf16 %v1251_v9 }
  0x2e   :  { %541 = vmatpush.msrb.mxu3 %v184_v23  ;;  %504 = vmatpush.msrb.mxu1 %v114_v52  ;;  %v210_v3 = vunpack.c.h.bf16 %v1179_v43  ;;  %v100_v59 = vunpack.c.h.bf16 %v1292_v36  ;;  %v134_v38 = vunpack.c.h.bf16 %v1275_v25  ;;  %v168_v54 = vunpack.c.h.bf16 %v1258_v15  ;;  %v2017_v15 = vld [vmem:[#allocation8_spill] sm:$0xff]  ;;  %v2020_v52 = vld [vmem:[#allocation10_spill] sm:$0xff] }
  0x2f   :  { %493 = vmatpush.msrb.mxu0 %v223_v11  ;;  %523 = vmatpush.msrb.mxu2 %v148_v40  ;;  %v208_v19 = vunpack.c.h.bf16 %v1191_v47  ;;  %v98_v9 = vunpack.c.h.bf16 %v1316_v53  ;;  %v132_v43 = vunpack.c.h.bf16 %v1299_v44  ;;  %v206_v36 = vunpack.c.h.bf16 %v1215_v55  ;;  %v2018_v11 = vld [vmem:[#allocation5_spill] sm:$0xff] }
  0x30   :  { %542 = vmatpush.msrb.mxu3 %v182_v1  ;;  %505 = vmatpush.msrb.mxu1 %v112_v13  ;;  %v96_v25 = vunpack.c.h.bf16 %v1340_v14  ;;  %v130_v47 = vunpack.c.h.bf16 %v1323_v60  ;;  %v164_v23 = vunpack.c.h.bf16 %v2017_v15  ;;  %v204_v53 = vunpack.c.h.bf16 %v2018_v11  ;;  %v2021_v1 = vld [vmem:[#allocation6_spill] sm:$0xff] }
  0x31   :  { %494 = vmatpush.msrb.mxu0 %v221_v10  ;;  %524 = vmatpush.msrb.mxu2 %v146_v20  ;;  %v94_v44 = vunpack.c.h.bf16 %v1364_v45  ;;  %v128_v55 = vunpack.c.h.bf16 %v2019_v32  ;;  %v162_v40 = vunpack.c.h.bf16 %v2020_v52  ;;  %v202_v14 = vunpack.c.h.bf16 %v2021_v1  ;;  %v2022_v10 = vld [vmem:[#allocation15_spill] sm:$0xff]  ;;  %v2023_v20 = vld [vmem:[#allocation13_spill] sm:$0xff] }
  0x32   :  { %543 = vmatpush.msrb.mxu3 %v180_v18  ;;  %506 = vmatpush.msrb.mxu1 %v110_v21  ;;  %v92_v60 = vunpack.c.h.bf16 %v1388_v61  ;;  %v126_v13 = vunpack.c.h.bf16 %v2022_v10  ;;  %v160_v18 = vunpack.c.h.bf16 %v2023_v20  ;;  %v2025_v21 = vld [vmem:[#allocation19_spill] sm:$0xff]  ;;  %v1645_v11 = vld [vmem:[%s1982_s2 + $0x8c] sm:$0xff]  ;;  %v1664_v52 = vld [vmem:[%s1982_s2 + $0x64] sm:$0xff] }
  0x33   :  { %495 = vmatpush.msrb.mxu0 %v219_v2  ;;  %525 = vmatpush.msrb.mxu2 %v144_v24  ;;  %v2024_v2 = vld [vmem:[#allocation7_spill] sm:$0xff]  ;;  %v234_v24 = vunpack.c.h.bf16 %v2025_v21  ;;  %v1683_v20 = vld [vmem:[%s1982_s2 + $0x28] sm:$0xff]  ;;  %v1695_v21 = vld [vmem:[%s1982_s2] sm:$0xff] }
  0x34   :  { %952 = vmatmul.msk.f32.vlgmr.msrb.gmra.mxu0 %vm397_vm0, %v387_v6  ;;  %544 = vmatpush.msrb.mxu3 %v178_v30  ;;  %v200_v45 = vunpack.c.h.bf16 %v2024_v2  ;;  %v2026_v30 = vld [vmem:[#allocation18_spill] sm:$0xff]  ;;  %v1677_v10 = vld [vmem:[%s1982_s2 + $0x3c] sm:$0xff] }
  0x35   :  { %560 = vmatpush.msra.mxu0 %v218_v27  ;;  %507 = vmatpush.msrb.mxu1 %v108_v28  ;;  %v124_v27 = vunpack.c.h.bf16 %v2026_v30  ;;  %v2027_v28 = vld [vmem:[#allocation16_spill] sm:$0xff]  ;;  %v1689_v2 = vld [vmem:[%s1982_s2 + $0x14] sm:$0xff] }
  0x36   :  { %526 = vmatpush.msrb.mxu2 %v142_v5  ;;  %545 = vmatpush.msrb.mxu3 %v176_v37  ;;  %v158_v5 = vunpack.c.h.bf16 %v2027_v28  ;;  %v2028_v37 = vld [vmem:[#allocation9_spill] sm:$0xff]  ;;  %v282_v30 = vld [vmem:[%s1982_s2 + $0x13c] sm:$0xf] }
  0x37   :  { %561 = vmatpush.msra.mxu0 %v216_v7  ;;  %508 = vmatpush.msrb.mxu1 %v106_v33  ;;  %v198_v61 = vunpack.c.h.bf16 %v2028_v37  ;;  %v232_v7 = vunpack.c.h.bf16 %v1421_v49  ;;  %v156_v33 = vunpack.c.h.bf16 %v1409_v31  ;;  %v2030_v49 = vld [vmem:[#allocation14_spill] sm:$0xff]  ;;  %v1563_v31 = vld [vmem:[%s1982_s2 + $0x118] sm:$0xff]  ;;  %v279_v28 = vld [vmem:[%s1982_s2 + $0x128] sm:$0xf] }
  0x38   :  { %527 = vmatpush.msrb.mxu2 %v140_v17  ;;  %546 = vmatpush.msrb.mxu3 %v174_v34  ;;  %v2029_v17 = vld [vmem:[#allocation11_spill] sm:$0xff] }
  0x39   :  { %562 = vmatpush.msra.mxu0 %v214_v48  ;;  %509 = vmatpush.msrb.mxu1 %v104_v41  ;;  %v196_v34 = vunpack.c.h.bf16 %v2029_v17  ;;  %v230_v48 = vunpack.c.h.bf16 %v1440_v0  ;;  %v1556_v41 = vld [vmem:[%s1982_s2 + $0x12c] sm:$0xff]  ;;  %v276_v37 = vld [vmem:[%s1982_s2 + $0x114] sm:$0xf] }
  0x3a   :  { %528 = vmatpush.msrb.mxu2 %v138_v22  ;;  %547 = vmatpush.msrb.mxu3 %v172_v42  ;;  %v194_v22 = vunpack.c.h.bf16 %v2030_v49  ;;  %v228_v42 = vunpack.c.h.bf16 %v1449_v39  ;;  %v364_v0 = vunpack.c.l.bf16 %v1556_v41  ;;  %v1573_v39 = vld [vmem:[%s1982_s2 + $0x104] sm:$0xff]  ;;  %v270_v17 = vld [vmem:[%s1982_s2 + $0xec] sm:$0xf]  ;;  %v1717_v49 = vld [vmem:[%s1982_s2 + $0xd0] sm:$0xff] }
  0x3b   :  { %563 = vmatpush.msra.mxu0 %v212_v56  ;;  %510 = vmatpush.msrb.mxu1 %v102_v51  ;;  %v2031_v56 = vld [vmem:[#allocation17_spill] sm:$0xff] }
  0x3c   :  { %529 = vmatpush.msrb.mxu2 %v136_v29  ;;  %548 = vmatpush.msrb.mxu3 %v170_v46  ;;  %v192_v51 = vunpack.c.h.bf16 %v2031_v56  ;;  %v226_v29 = vunpack.c.h.bf16 %v1458_v35  ;;  %v2032_v46 = vld [vmem:[#allocation20_spill] sm:$0xff]  ;;  %v1585_v35 = vld [vmem:[%s1982_s2 + $0xf0] sm:$0xff] }
  0x3d   :  { %564 = vmatpush.msra.mxu0 %v210_v3  ;;  %511 = vmatpush.msrb.mxu1 %v100_v59  ;;  %v190_v3 = vunpack.c.h.bf16 %v2032_v46  ;;  %v224_v59 = vunpack.c.h.bf16 %v1469_v26  ;;  %v1593_v26 = vld [vmem:[%s1982_s2 + $0xdc] sm:$0xff]  ;;  %v1735_v46 = vld [vmem:[%s1982_s2 + $0xa8] sm:$0xff] }
  0x3e   :  { %530 = vmatpush.msrb.mxu2 %v134_v38  ;;  %549 = vmatpush.msrb.mxu3 %v168_v54  ;;  %v354_v38 = vunpack.c.l.bf16 %v1573_v39  ;;  %v349_v54 = vunpack.c.l.bf16 %v1585_v35  ;;  %v1726_v56 = vld [vmem:[%s1982_s2 + $0xbc] sm:$0xff] }
  0x3f   :  { %565 = vmatpush.msra.mxu0 %v208_v19  ;;  %512 = vmatpush.msrb.mxu1 %v98_v9  ;;  %v1599_v19 = vld [vmem:[%s1982_s2 + $0x134] sm:$0xff]  ;;  %v220_v9 = vunpack.c.h.bf16 %v1491_v12 }
  0x40   :  { %531 = vmatpush.msrb.mxu2 %v132_v43  ;;  %550 = vmatpush.msrb.mxu3 %v166_v62  ;;  %v1611_v43 = vld [vmem:[%s1982_s2 + $0x120] sm:$0xff]  ;;  %v1616_v12 = vld [vmem:[%s1982_s2 + $0xb4] sm:$0xff]  ;;  %v366_v62 = vunpack.c.l.bf16 %v1599_v19 }
  0x41   :  { %566 = vmatpush.msra.mxu0 %v206_v36  ;;  %513 = vmatpush.msrb.mxu1 %v96_v25  ;;  %v1625_v25 = vld [vmem:[%s1982_s2 + $0x10c] sm:$0xff]  ;;  %v361_v15 = vunpack.c.l.bf16 %v1611_v43 }
  0x42   :  { %532 = vmatpush.msrb.mxu2 %v130_v47  ;;  %551 = vmatpush.msrb.mxu3 %v164_v23  ;;  %v1630_v47 = vld [vmem:[%s1982_s2 + $0xa0] sm:$0xff]  ;;  %v1640_v23 = vld [vmem:[%s1982_s2 + $0xf8] sm:$0xff] }
  0x43   :  { %567 = vmatpush.msra.mxu0 %v204_v53  ;;  %514 = vmatpush.msrb.mxu1 %v94_v44  ;;  %v356_v53 = vunpack.c.l.bf16 %v1625_v25  ;;  %v329_v57 = vunpack.c.l.bf16 %v1630_v47  ;;  %v1657_v44 = vld [vmem:[%s1982_s2 + $0x78] sm:$0xff]  ;;  %v351_v32 = vunpack.c.l.bf16 %v1640_v23 }
  0x44   :  { %533 = vmatpush.msrb.mxu2 %v128_v55  ;;  %552 = vmatpush.msrb.mxu3 %v162_v40  ;;  %v324_v55 = vunpack.c.l.bf16 %v1645_v11  ;;  %v319_v1 = vunpack.c.l.bf16 %v1657_v44 }
  0x45   :  { %568 = vmatpush.msra.mxu0 %v202_v14  ;;  %515 = vmatpush.msrb.mxu1 %v92_v60  ;;  %v1671_v14 = vld [vmem:[%s1982_s2 + $0x50] sm:$0xff]  ;;  %v314_v60 = vunpack.c.l.bf16 %v1664_v52 }
  0x46   :  { %534 = vmatpush.msrb.mxu2 %v126_v13  ;;  %553 = vmatpush.msrb.mxu3 %v160_v18  ;;  %v309_v13 = vunpack.c.l.bf16 %v1671_v14  ;;  %v304_v18 = vunpack.c.l.bf16 %v1677_v10 }
  0x47   :  { %569 = vmatpush.msra.mxu0 %v200_v45  ;;  %588 = vmatpush.msra.mxu1 %v234_v24  ;;  %v299_v45 = vunpack.c.l.bf16 %v1683_v20  ;;  %v294_v24 = vunpack.c.l.bf16 %v1689_v2 }
  0x48   :  { %535 = vmatpush.msrb.mxu2 %v124_v27  ;;  %554 = vmatpush.msrb.mxu3 %v158_v5  ;;  %v289_v27 = vunpack.c.l.bf16 %v1695_v21  ;;  %v368_v5 = vunpack.c.l.bf16 %v282_v30 }
  0x49   :  { %570 = vmatpush.msra.mxu0 %v198_v61  ;;  %589 = vmatpush.msra.mxu1 %v232_v7  ;;  %v363_v61 = vunpack.c.l.bf16 %v279_v28  ;;  %v273_v7 = vld [vmem:[%s1982_s2 + $0x100] sm:$0xf]  ;;  %v243_v28 = vld [vmem:[%s1982_s2 + $0x38] sm:$0xf] }
  0x4a   :  { %536 = vmatmul.f32.vlgmr.msrb.gmra.mxu2 %v384_v4  ;;  %555 = vmatpush.msrb.mxu3 %v156_v33  ;;  %v359_v4 = vunpack.c.l.bf16 %v1563_v31  ;;  %v358_v33 = vunpack.c.l.bf16 %v276_v37  ;;  %v240_v37 = vld [vmem:[%s1982_s2 + $0x24] sm:$0xf] }
  0x4b   :  { %571 = vmatpush.msra.mxu0 %v196_v34  ;;  %590 = vmatpush.msra.mxu1 %v230_v48  ;;  %v353_v34 = vunpack.c.l.bf16 %v273_v7  ;;  %v348_v48 = vunpack.c.l.bf16 %v270_v17  ;;  %v1806_v7 = vld [vmem:[%s1982_s2 + $0x154] sm:$0xff]  ;;  %v1816_v17 = vld [vmem:[%s1982_s2 + $0x15c] sm:$0xff] }
  0x4c   :  { %556 = vmatmul.f32.vlgmr.msrb.gmra.mxu3 %v385_v50  ;;  %516 = vmatmul.f32.vlgmr.msrb.gmra.mxu1 %v383_v16  ;;  %v188_v50 = vunpack.c.h.bf16 %v1433_v58  ;;  %v222_v16 = vunpack.c.h.bf16 %v1480_v8  ;;  %v1605_v58 = vld [vmem:[%s1982_s2 + $0xc8] sm:$0xff]  ;;  %v344_v8 = vunpack.c.l.bf16 %v1593_v26 }
  0x4d   :  { %572 = vmatpush.msra.mxu0 %v194_v22  ;;  %591 = vmatpush.msra.mxu1 %v228_v42  ;;  %v339_v36 = vunpack.c.l.bf16 %v1605_v58  ;;  %v267_v22 = vld [vmem:[%s1982_s2 + $0xd8] sm:$0xf]  ;;  %v341_v42 = vunpack.c.l.bf16 %v1717_v49 }
  0x4e   :  { %617 = vmatpush.msra.mxu2 %v364_v0  ;;  %v343_v0 = vunpack.c.l.bf16 %v267_v22  ;;  %v374_v22 = vunpack.c.l.bf16 %v1806_v7 }
  0x4f   :  { %573 = vmatpush.msra.mxu0 %v192_v51  ;;  %592 = vmatpush.msra.mxu1 %v226_v29  ;;  %v264_v51 = vld [vmem:[%s1982_s2 + $0xc4] sm:$0xf]  ;;  %v336_v29 = vunpack.c.l.bf16 %v1726_v56 }
  0x50   :  { %618 = vmatpush.msra.mxu2 %v359_v4  ;;  %v338_v4 = vunpack.c.l.bf16 %v264_v51  ;;  %651 = vmatpush.msra.mxu3 %v374_v22 }
  0x51   :  { %574 = vmatpush.msra.mxu0 %v190_v3  ;;  %593 = vmatpush.msra.mxu1 %v224_v59  ;;  %v261_v3 = vld [vmem:[%s1982_s2 + $0xb0] sm:$0xf]  ;;  %v331_v59 = vunpack.c.l.bf16 %v1735_v46 }
  0x52   :  { %619 = vmatpush.msra.mxu2 %v354_v38  ;;  %v333_v38 = vunpack.c.l.bf16 %v261_v3  ;;  %v1833_v3 = vld [vmem:[%s1982_s2 + $0x148] sm:$0xff] }
  0x53   :  { %575 = vmatpush.msra.mxu0 %v188_v50  ;;  %594 = vmatpush.msra.mxu1 %v222_v16  ;;  %v1744_v50 = vld [vmem:[%s1982_s2 + $0x94] sm:$0xff]  ;;  %v258_v16 = vld [vmem:[%s1982_s2 + $0x9c] sm:$0xf] }
  0x54   :  { %576 = vmatmul.f32.vlgmr.msra.gmra.mxu0 %v386_v63  ;;  %620 = vmatpush.msra.mxu2 %v349_v54  ;;  %v334_v63 = vunpack.c.l.bf16 %v1616_v12  ;;  %v326_v54 = vunpack.c.l.bf16 %v1744_v50 }
  0x55   :  { %595 = vmatpush.msra.mxu1 %v220_v9  ;;  %v328_v9 = vunpack.c.l.bf16 %v258_v16 }
  0x56   :  { %953 = vmatmul.msk.f32.vlgmr.msra.gmra.mxu1 %vm397_vm0, %v387_v6  ;;  %621 = vmatpush.msra.mxu2 %v344_v8  ;;  %v1652_v6 = vld [vmem:[%s1982_s2 + $0xe4] sm:$0xff] }
  0x57   :  { %697 = vmatpush.msrb.mxu1 %v366_v62  ;;  %v346_v40 = vunpack.c.l.bf16 %v1652_v6  ;;  %v1753_v8 = vld [vmem:[%s1982_s2 + $0x80] sm:$0xff]  ;;  %v255_v62 = vld [vmem:[%s1982_s2 + $0x88] sm:$0xf] }
  0x58   :  { %622 = vmatpush.msra.mxu2 %v339_v36  ;;  %v321_v36 = vunpack.c.l.bf16 %v1753_v8 }
  0x59   :  { %698 = vmatpush.msrb.mxu1 %v361_v15  ;;  %v323_v15 = vunpack.c.l.bf16 %v255_v62  ;;  %v362_v62 = vunpack.c.h.bf16 %v1611_v43  ;;  %v352_v43 = vunpack.c.h.bf16 %v1640_v23  ;;  %v335_v23 = vunpack.c.h.bf16 %v1616_v12 }
  0x5a   :  { %623 = vmatpush.msra.mxu2 %v334_v63  ;;  %v1762_v63 = vld [vmem:[%s1982_s2 + $0x6c] sm:$0xff]  ;;  %v320_v12 = vunpack.c.h.bf16 %v1657_v44  ;;  %v305_v44 = vunpack.c.h.bf16 %v1677_v10 }
  0x5b   :  { %699 = vmatpush.msrb.mxu1 %v356_v53  ;;  %v252_v53 = vld [vmem:[%s1982_s2 + $0x74] sm:$0xf] }
  0x5c   :  { %624 = vmatpush.msra.mxu2 %v329_v57  ;;  %v316_v57 = vunpack.c.l.bf16 %v1762_v63 }
  0x5d   :  { %700 = vmatpush.msrb.mxu1 %v351_v32  ;;  %v318_v32 = vunpack.c.l.bf16 %v252_v53  ;;  %v345_v53 = vunpack.c.h.bf16 %v1593_v26  ;;  %v337_v26 = vunpack.c.h.bf16 %v1726_v56  ;;  %v322_v56 = vunpack.c.h.bf16 %v1753_v8 }
  0x5e   :  { %625 = vmatpush.msra.mxu2 %v324_v55  ;;  %v1771_v55 = vld [vmem:[%s1982_s2 + $0x58] sm:$0xff]  ;;  %v300_v8 = vunpack.c.h.bf16 %v1683_v20 }
  0x5f   :  { %701 = vmatpush.msrb.mxu1 %v346_v40  ;;  %v249_v40 = vld [vmem:[%s1982_s2 + $0x60] sm:$0xf] }
  0x60   :  { %626 = vmatpush.msra.mxu2 %v319_v1  ;;  %v311_v1 = vunpack.c.l.bf16 %v1771_v55 }
  0x61   :  { %702 = vmatpush.msrb.mxu1 %v341_v42  ;;  %v376_v42 = vunpack.c.l.bf16 %v1816_v17 }
  0x62   :  { %627 = vmatpush.msra.mxu2 %v314_v60  ;;  %v313_v60 = vunpack.c.l.bf16 %v249_v40 }
  0x63   :  { %703 = vmatpush.msrb.mxu1 %v336_v29  ;;  %731 = vmatpush.msrb.mxu0 %v376_v42 }
  0x64   :  { %628 = vmatpush.msra.mxu2 %v309_v13  ;;  %v1780_v13 = vld [vmem:[%s1982_s2 + $0x44] sm:$0xff] }
  0x65   :  { %704 = vmatpush.msrb.mxu1 %v331_v59  ;;  %v365_v59 = vunpack.c.h.bf16 %v1556_v41  ;;  %v355_v41 = vunpack.c.h.bf16 %v1573_v39  ;;  %v340_v39 = vunpack.c.h.bf16 %v1605_v58 }
  0x66   :  { %629 = vmatpush.msra.mxu2 %v304_v18  ;;  %v246_v18 = vld [vmem:[%s1982_s2 + $0x4c] sm:$0xf] }
  0x67   :  { %705 = vmatpush.msrb.mxu1 %v326_v54  ;;  %v308_v30 = vunpack.c.l.bf16 %v246_v18  ;;  %v371_v54 = vunpack.c.l.bf16 %v1833_v3 }
  0x68   :  { %630 = vmatpush.msra.mxu2 %v299_v45  ;;  %v1788_v45 = vld [vmem:[%s1982_s2 + $0x30] sm:$0xff] }
  0x69   :  { %706 = vmatpush.msrb.mxu1 %v321_v36  ;;  %v1844_v36 = vld [vmem:[%s1983_s3] ss:$2 sm:$0x3]  ;;  %732 = vmatpush.msrb.mxu0 %v371_v54 }
  0x6a   :  { %631 = vmatpush.msra.mxu2 %v294_v24  ;;  %v306_v24 = vunpack.c.l.bf16 %v1780_v13  ;;  %v394_v10 = vperm.slane %v1844_v36, 1 }
  0x6b   :  { %707 = vmatpush.msrb.mxu1 %v316_v57  ;;  %v347_v57 = vunpack.c.h.bf16 %v1652_v6 }
  0x6c   :  { %632 = vmatpush.msra.mxu2 %v289_v27  ;;  %v301_v27 = vunpack.c.l.bf16 %v1788_v45 }
  0x6d   :  { %708 = vmatpush.msrb.mxu1 %v311_v1 }
  0x6e   :  { %777 = vmatpush.msrb.mxu2 %v368_v5  ;;  %v1798_v5 = vld [vmem:[%s1982_s2 + $0x1c] sm:$0xff] }
  0x6f   :  { %709 = vmatpush.msrb.mxu1 %v306_v24  ;;  %v330_v24 = vunpack.c.h.bf16 %v1630_v47  ;;  %v315_v47 = vunpack.c.h.bf16 %v1664_v52  ;;  %v307_v52 = vunpack.c.h.bf16 %v1780_v13 }
  0x70   :  { %778 = vmatpush.msrb.mxu2 %v363_v61  ;;  %v303_v61 = vunpack.c.l.bf16 %v243_v28 }
  0x71   :  { %710 = vmatpush.msrb.mxu1 %v301_v27  ;;  %v327_v27 = vunpack.c.h.bf16 %v1744_v50  ;;  %v312_v50 = vunpack.c.h.bf16 %v1771_v55  ;;  %v297_v55 = vunpack.c.h.bf16 %v1798_v5 }
  0x72   :  { %779 = vmatpush.msrb.mxu2 %v358_v33  ;;  %v1811_v33 = vld [vmem:[%s1982_s2 + $0x8] sm:$0xff] }
  0x73   :  { %v291_v51 = vunpack.c.l.bf16 %v1811_v33  ;;  %v292_v22 = vunpack.c.h.bf16 %v1811_v33 }
  0x74   :  { %780 = vmatpush.msrb.mxu2 %v353_v34  ;;  %v296_v34 = vunpack.c.l.bf16 %v1798_v5 }
  0x76   :  { %781 = vmatpush.msrb.mxu2 %v348_v48  ;;  %v298_v48 = vunpack.c.l.bf16 %v240_v37  ;;  %711 = vmatpush.msrb.mxu1 %v296_v34  ;;  %v377_v34 = vunpack.c.h.bf16 %v1816_v17  ;;  %v290_v17 = vunpack.c.h.bf16 %v1695_v21  ;;  %v375_v21 = vunpack.c.h.bf16 %v1806_v7 }
  0x78   :  { %782 = vmatpush.msrb.mxu2 %v343_v0  ;;  %v237_v0 = vld [vmem:[%s1982_s2 + $0x10] sm:$0xf]  ;;  %712 = vmatpush.msrb.mxu1 %v291_v51 }
  0x79   :  { %v293_v29 = vunpack.c.l.bf16 %v237_v0 }
  0x7a   :  { %783 = vmatpush.msrb.mxu2 %v338_v4  ;;  %v1828_v4 = vld [vmem:[%s1982_s2 + $0x140] sm:$0xff]  ;;  %771 = vmatpush.msra.mxu1 %v377_v34 }
  0x7b   :  { %v369_v16 = vunpack.c.l.bf16 %v1828_v4 }
  0x7c   :  { %784 = vmatpush.msrb.mxu2 %v333_v38  ;;  %v367_v38 = vunpack.c.h.bf16 %v1599_v19  ;;  %v357_v19 = vunpack.c.h.bf16 %v1625_v25  ;;  %v342_v25 = vunpack.c.h.bf16 %v1717_v49  ;;  %v325_v49 = vunpack.c.h.bf16 %v1645_v11 }
  0x7d   :  { %652 = vmatpush.msra.mxu3 %v369_v16  ;;  %v310_v11 = vunpack.c.h.bf16 %v1671_v14  ;;  %v295_v14 = vunpack.c.h.bf16 %v1689_v2  ;;  %v285_v16 = vld [vmem:[%s1982_s2 + $0x150] sm:$0xf] }
  0x7e   :  { %785 = vmatpush.msrb.mxu2 %v328_v9  ;;  %v360_v9 = vunpack.c.h.bf16 %v1563_v31  ;;  %737 = vmatpush.msra.mxu0 %v367_v38  ;;  %v350_v31 = vunpack.c.h.bf16 %v1585_v35  ;;  %v288_v38 = vld [vmem:[%s1982_s2 + $0x164] sm:$0xf]  ;;  %v373_v54 = vunpack.c.l.bf16 %v285_v16  ;;  %s1011_s2 = smov [#allocation2]  }
  0x7f   :  { %657 = vmatpush.msrb.mxu3 %v365_v59  ;;  %v370_v59 = vunpack.c.h.bf16 %v1828_v4  ;;  %v378_v7 = vunpack.c.l.bf16 %v288_v38  ;;  %v951_v4 = vld [vmem:[%s1983_s3 + $0x1] ss:$2 sm:$0x1f]  ;;  %s940_s3 = sshll.u32 %s1011_s2, 4  ;;  %s941_s3 = int_to_ptr.vmem [resolvable:$true] %s940_s3 }
  0x80   :  { %786 = vmatpush.msrb.mxu2 %v323_v15  ;;  %v393_v15 = vperm.slane %v1844_v36, 0  ;;  %738 = vmatpush.msra.mxu0 %v362_v62  ;;  %v605_v62 = vperm.slane %v951_v4, 2 }
  0x81   :  { %658 = vmatpush.msrb.mxu3 %v360_v9 }
  0x82   :  { %787 = vmatpush.msrb.mxu2 %v318_v32  ;;  %739 = vmatpush.msra.mxu0 %v357_v19  ;;  %v606_v19 = vperm.slane %v951_v4, 3 }
  0x83   :  { %659 = vmatpush.msrb.mxu3 %v355_v41  ;;  %v603_v41 = vperm.slane %v951_v4, 0 }
  0x84   :  { %788 = vmatpush.msrb.mxu2 %v313_v60  ;;  %740 = vmatpush.msra.mxu0 %v352_v43 }
  0x85   :  { %660 = vmatpush.msrb.mxu3 %v350_v31 }
  0x86   :  { %789 = vmatpush.msrb.mxu2 %v308_v30  ;;  %741 = vmatpush.msra.mxu0 %v347_v57  ;;  %v332_v30 = vunpack.c.h.bf16 %v1735_v46  ;;  %v317_v46 = vunpack.c.h.bf16 %v1762_v63  ;;  %v302_v63 = vunpack.c.h.bf16 %v1788_v45 }
  0x87   :  { %661 = vmatpush.msrb.mxu3 %v345_v53 }
  0x88   :  { %790 = vmatpush.msrb.mxu2 %v303_v61  ;;  %742 = vmatpush.msra.mxu0 %v342_v25 }
  0x89   :  { %662 = vmatpush.msrb.mxu3 %v340_v39 }
  0x8a   :  { %791 = vmatpush.msrb.mxu2 %v298_v48  ;;  %743 = vmatpush.msra.mxu0 %v337_v26  ;;  %v372_v48 = vunpack.c.h.bf16 %v1833_v3 }
  0x8b   :  { %663 = vmatpush.msrb.mxu3 %v335_v23 }
  0x8c   :  { %792 = vmatpush.msrb.mxu2 %v293_v29  ;;  %744 = vmatpush.msra.mxu0 %v332_v30 }
  0x8d   :  { %664 = vmatpush.msrb.mxu3 %v330_v24  ;;  %772 = vmatpush.msra.mxu1 %v372_v48 }
  0x8e   :  { %745 = vmatpush.msra.mxu0 %v327_v27 }
  0x8f   :  { %665 = vmatpush.msrb.mxu3 %v325_v49 }
  0x90   :  { %746 = vmatpush.msra.mxu0 %v322_v56 }
  0x91   :  { %666 = vmatpush.msrb.mxu3 %v320_v12 }
  0x92   :  { %747 = vmatpush.msra.mxu0 %v317_v46 }
  0x93   :  { %667 = vmatpush.msrb.mxu3 %v315_v47 }
  0x94   :  { %748 = vmatpush.msra.mxu0 %v312_v50 }
  0x95   :  { %668 = vmatpush.msrb.mxu3 %v310_v11 }
  0x96   :  { %749 = vmatpush.msra.mxu0 %v307_v52 }
  0x97   :  { %669 = vmatpush.msrb.mxu3 %v305_v44 }
  0x98   :  { %750 = vmatpush.msra.mxu0 %v302_v63 }
  0x99   :  { %670 = vmatpush.msrb.mxu3 %v300_v8 }
  0x9a   :  { %751 = vmatpush.msra.mxu0 %v297_v55 }
  0x9b   :  { %671 = vmatpush.msrb.mxu3 %v295_v14 }
  0x9c   :  { %752 = vmatpush.msra.mxu0 %v292_v22 }
  0x9d   :  { %672 = vmatpush.msrb.mxu3 %v290_v17 }
  0xa5   :  { %v417_v32 = vpop.f32.mrf.mxu0 }
  0xa6   :  { %v418_v40 = vadd.f32 %v417_v32, %v393_v15 }
  0xa9   :  { %v457_v35 = vpop.f32.mrf.mxu2 }
  0xaa   :  { %v437_v1 = vpop.f32.mrf.mxu1 }
  0xab   :  { %v438_v60 = vadd.f32 %v437_v1, %v418_v40 }
  0xad   :  { %v458_v6 = vadd.f32 %v457_v35, %v438_v60  ;;  %v477_v18 = vpop.f32.mrf.mxu3 }
  0xaf   :  { %v478_v58 = vadd.f32 %v477_v18, %v458_v6  ;;  %v604_v6 = vperm.slane %v951_v4, 1 }
  0xb1   :  { %v497_v28 = vpop.f32.mrf.mxu0 }
  0xb2   :  { %v498_v37 = vadd.f32 %v497_v28, %v478_v58  ;;  %v607_v28 = vperm.slane %v951_v4, 4 }
  0xb4   :  { %v600_v61 = vmax.f32 %v498_v37, 0.0 }
  0xb6   :  { %633 = vmatmul.f32.vlgmr.msra.gmra.mxu2 %v600_v61  ;;  %713 = vmatmul.f32.vlgmr.msrb.gmra.mxu1 %v600_v61 }
  0xbe   :  { %793 = vmatmul.f32.vlgmr.msrb.gmra.mxu2 %v600_v61 }
  0xc9   :  { %v517_v20 = vpop.f32.mrf.mxu1 }
  0xca   :  { %v518_v13 = vadd.f32 %v517_v20, %v394_v10 }
  0xcd   :  { %v537_v45 = vpop.f32.mrf.mxu2 }
  0xce   :  { %v538_v42 = vadd.f32 %v537_v45, %v518_v13 }
  0xcf   :  { %v557_v2 = vpop.f32.mrf.mxu3 }
  0xd0   :  { %v558_v0 = vadd.f32 %v557_v2, %v538_v42 }
  0xd1   :  { %v577_v5 = vpop.f32.mrf.mxu0 }
  0xd2   :  { %v578_v51 = vadd.f32 %v577_v5, %v558_v0 }
  0xd3   :  { %v597_v29 = vpop.f32.mrf.mxu1 }
  0xd4   :  { %v598_v3 = vadd.f32 %v597_v29, %v578_v51 }
  0xd6   :  { %v601_v33 = vmax.f32 %v598_v3, 0.0 }
  0xd8   :  { %954 = vmatmul.msk.f32.vlgmr.msra.gmra.mxu3 %vm613_vm1, %v601_v33  ;;  %956 = vmatmul.msk.f32.vlgmr.msrb.gmra.mxu0 %vm613_vm1, %v601_v33 }
  0xd9   :  { %957 = vmatmul.msk.f32.vlgmr.msra.gmra.mxu1 %vm613_vm1, %v601_v33  ;;  %691 = vmatpush.msra.mxu3 %v375_v21 }
  0xdb   :  { %692 = vmatpush.msra.mxu3 %v370_v59 }
  0xe0   :  { %673 = vmatmul.f32.vlgmr.msrb.gmra.mxu3 %v600_v61  ;;  %753 = vmatmul.f32.vlgmr.msra.gmra.mxu0 %v600_v61 }
  0xe1   :  { %811 = vmatpush.msrb.mxu3 %v378_v7 }
  0xe3   :  { %812 = vmatpush.msrb.mxu3 %v373_v54 }
  0xe8   :  { %955 = vmatmul.msk.f32.vlgmr.msra.gmra.mxu3 %vm613_vm1, %v601_v33 }
  0xf0   :  { %958 = vmatmul.msk.f32.vlgmr.msrb.gmra.mxu3 %vm613_vm1, %v601_v33 }
 0x133   :  { %v714_v36 = vpop.f32.mrf.mxu1 }
 0x134   :  { %v715_v15 = vadd.f32 %v714_v36, %v605_v62 }
 0x139   :  { %v634_v43 = vpop.f32.mrf.mxu2 }
 0x13a   :  { %v635_v53 = vadd.f32 %v634_v43, %v603_v41 }
 0x141   :  { %v794_v56 = vpop.f32.mrf.mxu2 }
 0x142   :  { %v795_v46 = vadd.f32 %v794_v56, %v607_v28  ;;  %v930_v56 = vlaneseq }
 0x155   :  { %v734_v9 = vpop.f32.mrf.mxu0 }
 0x156   :  { %v735_v57 = vadd.f32 %v734_v9, %v715_v15  ;;  %v774_v39 = vpop.f32.mrf.mxu1 }
 0x158   :  { %v961_v35 = vmul.f32 -1.442695, %v735_v57 }
 0x15a   :  { %965 = vpow2.f32 %v961_v35 }
 0x15b   :  { %v654_v31 = vpop.f32.mrf.mxu3 }
 0x15c   :  { %v655_v25 = vadd.f32 %v654_v31, %v635_v53 }
 0x15d   :  { %v754_v32 = vpop.f32.mrf.mxu0 }
 0x15e   :  { %v755_v40 = vadd.f32 %v754_v32, %v606_v19  ;;  %v959_v23 = vmul.f32 -1.442695, %v655_v25 }
 0x160   :  { %v775_v1 = vadd.f32 %v774_v39, %v755_v40  ;;  %v966_v24 = vpop.eup %965 }
 0x161   :  { %v1894_v37 = vadd.f32 1.0, %v966_v24 }
 0x162   :  { %v962_v60 = vmul.f32 -1.442695, %v775_v1 }
 0x163   :  { %v674_v26 = vpop.f32.mrf.mxu3  ;;  %v878_v0 = vand.u32 2147483648, %v1894_v37  ;;  %v876_v51 = vand.u32 2147483647, %v1894_v37  ;;  %vm872_vm3 = vweird.f32 %v1894_v37 }
 0x164   :  { %967 = vpow2.f32 %v962_v60  ;;  %v675_v18 = vadd.f32 %v674_v26, %v604_v6 }
 0x165   :  { %969 = vpow2.f32 %v959_v23  ;;  %vm1925_vm5 = vcmp.eq.f32.partialorder %v876_v51, 8.507059e+37  ;;  %v879_v4 = vor.u32 1.1754944e-38, %v878_v0 }
 0x16a   :  { %v968_v58 = vpop.eup %967 }
 0x16b   :  { %v694_v30 = vpop.f32.mrf.mxu3  ;;  %v970_v27 = vpop.eup %969  ;;  %v1896_v61 = vadd.f32 1.0, %v968_v58 }
 0x16c   :  { %v695_v49 = vadd.f32 %v694_v30, %v675_v18  ;;  %v1898_v47 = vadd.f32 1.0, %v970_v27 }
 0x16d   :  { %v893_v53 = vand.u32 2147483648, %v1896_v61  ;;  %vm887_vm12 = vweird.f32 %v1896_v61  ;;  %v891_v39 = vand.u32 2147483647, %v1896_v61 }
 0x16e   :  { %v960_v12 = vmul.f32 -1.442695, %v695_v49  ;;  %v848_v16 = vand.u32 2147483648, %v1898_v47  ;;  %v846_v62 = vand.u32 2147483647, %v1898_v47  ;;  %vm842_vm13 = vweird.f32 %v1898_v47 }
 0x16f   :  { %v894_v58 = vor.u32 1.1754944e-38, %v893_v53 }
 0x170   :  { %971 = vpow2.f32 %v960_v12  ;;  %vm1948_vm14 = vcmp.eq.f32.partialorder %v846_v62, 8.507059e+37  ;;  %v849_v30 = vor.u32 1.1754944e-38, %v848_v16 }
 0x171   :  { %973 = vrcp.f32 %v1894_v37 }
 0x172   :  { %975 = vrcp.f32 %v1896_v61 }
 0x173   :  { %v814_v34 = vpop.f32.mrf.mxu3  ;;  %977 = vrcp.f32 %v1898_v47 }
 0x174   :  { %v815_v11 = vadd.f32 %v814_v34, %v795_v46 }
 0x176   :  { %v972_v50 = vpop.eup %971  ;;  %v963_v48 = vmul.f32 -1.442695, %v815_v11 }
 0x177   :  { %v833_v44 = vadd.f32 1.0, %v972_v50  ;;  %v1903_v52 = vpop.eup %973 }
 0x178   :  { %979 = vpow2.f32 %v963_v48  ;;  %v1905_v8 = vpop.eup %975  ;;  %v868_v14 = vmul.f32 %v1903_v52, %v1894_v37  ;;  %vm873_vm7 = vweird.f32 %v1903_v52 }
 0x179   :  { %981 = vrcp.f32 %v833_v44  ;;  %v1907_v63 = vpop.eup %977  ;;  %v883_v55 = vmul.f32 %v1905_v8, %v1896_v61  ;;  %v863_v21 = vand.u32 2147483648, %v833_v44  ;;  %v861_v38 = vand.u32 2147483647, %v833_v44  ;;  %vm1940_vm11 = vmor %vm872_vm3, %vm873_vm7 }
 0x17a   :  { %v838_v17 = vmul.f32 %v1907_v63, %v1898_v47  ;;  %v869_v20 = vsub.f32 1.0, %v868_v14  ;;  %vm857_vm4 = vweird.f32 %v833_v44  ;;  %vm888_vm8 = vweird.f32 %v1905_v8 }
 0x17b   :  { %v884_v45 = vsub.f32 1.0, %v883_v55  ;;  %v864_v41 = vor.u32 1.1754944e-38, %v863_v21  ;;  %vm843_vm9 = vweird.f32 %v1907_v63  ;;  %vm862_vm10 = vcmp.eq.f32.partialorder %v861_v38, 8.507059e+37  ;;  %vm1957_vm15 = vmor %vm887_vm12, %vm888_vm8 }
 0x17c   :  { %v839_v2 = vsub.f32 1.0, %v838_v17  ;;  %v870_v29 = vmul.f32 %v1903_v52, %v869_v20  ;;  %vm1961_vm0 = vmor %vm842_vm13, %vm843_vm9  ;;  %vm892_vm3 = vcmp.eq.f32.partialorder %v891_v39, 8.507059e+37  ;;  %vm923_vm8 = vcmask 1041408  }
 0x17d   :  { %v885_v33 = vmul.f32 %v1905_v8, %v884_v45  ;;  %vm925_vm9 = vcmask 1043459  }
 0x17e   :  { %v980_v22 = vpop.eup %979  ;;  %v840_v59 = vmul.f32 %v1907_v63, %v839_v2  ;;  %v871_v36 = vadd.f32 %v1903_v52, %v870_v29 }
 0x17f   :  { %v982_v10 = vpop.eup %981  ;;  %v1915_v13 = vadd.f32 1.0, %v980_v22  ;;  %v886_v31 = vadd.f32 %v1905_v8, %v885_v33 }
 0x180   :  { %v853_v42 = vmul.f32 %v982_v10, %v833_v44  ;;  %vm858_vm2 = vweird.f32 %v982_v10  ;;  %v841_v43 = vadd.f32 %v1907_v63, %v840_v59  ;;  %v875_v35 = vsel %vm1940_vm11, %v1903_v52, %v871_v36 }
 0x181   :  { %983 = vrcp.f32 %v1915_v13  ;;  %vm859_vm6 = vmor %vm857_vm4, %vm858_vm2  ;;  %v908_v25 = vand.u32 2147483648, %v1915_v13  ;;  %v890_v6 = vsel %vm1957_vm15, %v1905_v8, %v886_v31  ;;  %v906_v18 = vand.u32 2147483647, %v1915_v13 }
 0x182   :  { %v854_v5 = vsub.f32 1.0, %v853_v42  ;;  %v845_v24 = vsel %vm1961_vm0, %v1907_v63, %v841_v43  ;;  %vm902_vm2 = vweird.f32 %v1915_v13  ;;  %vm921_vm4 = vcmask 1040384  }
 0x183   :  { %v880_v28 = vsel %vm1925_vm5, %v879_v4, %v875_v35  ;;  %v895_v37 = vsel %vm892_vm3, %v894_v58, %v890_v6  ;;  %v909_v12 = vor.u32 1.1754944e-38, %v908_v25  ;;  %v850_v61 = vsel %vm1948_vm14, %v849_v30, %v845_v24 }
 0x184   :  { %v855_v3 = vmul.f32 %v982_v10, %v854_v5  ;;  %vm907_vm7 = vcmp.eq.f32.partialorder %v906_v18, 8.507059e+37  ;;  %v918_v11 = vrot.slane %v880_v28, 6  ;;  %v919_v50 = vrot.slane %v895_v37, 5 }
 0x185   :  { %vm927_vm5 = vcmask 1042432  }
 0x186   :  { %v856_v7 = vadd.f32 %v982_v10, %v855_v3 }
 0x187   :  { %v984_v9 = vpop.eup %983 }
 0x188   :  { %v898_v19 = vmul.f32 %v984_v9, %v1915_v13  ;;  %v860_v15 = vsel %vm859_vm6, %v982_v10, %v856_v7  ;;  %vm903_vm1 = vweird.f32 %v984_v9 }
 0x189   :  { %v865_v32 = vsel %vm862_vm10, %v864_v41, %v860_v15  ;;  %vm904_vm6 = vmor %vm902_vm2, %vm903_vm1  ;;  %vm932_vm10 = vcmp.lt.s32.totalorder %v930_v56, 576 }
 0x18a   :  { %v899_v57 = vsub.f32 1.0, %v898_v19  ;;  %v917_v49 = vrot.slane %v865_v32, 7 }
 0x18c   :  { %v900_v23 = vmul.f32 %v984_v9, %v899_v57  ;;  %v922_v34 = vsel %vm921_vm4, %v850_v61, %v917_v49 }
 0x18d   :  { %v924_v44 = vsel %vm923_vm8, %v922_v34, %v918_v11 }
 0x18e   :  { %v901_v27 = vadd.f32 %v984_v9, %v900_v23 }
 0x190   :  { %v905_v47 = vsel %vm904_vm6, %v984_v9, %v901_v27 }
 0x191   :  { %v910_v46 = vsel %vm907_vm7, %v909_v12, %v905_v47 }
 0x192   :  { %v920_v48 = vrot.slane %v910_v46, 4 }
 0x194   :  { %v926_v52 = vsel %vm925_vm9, %v919_v50, %v920_v48 }
 0x195   :  { %v928_v8 = vsel %vm927_vm5, %v924_v44, %v926_v52 }
 0x196   :  { %934 = vst.msk [vmem:[#allocation2] sm:$0x1f] %vm932_vm10, %v928_v8 }
 0x197   :  { %945 = dma.vmem_to_hbm [thread:$0]  %s941_s3, 80, %s943_s5, [#allocation3]  }
 0x198   :  { %1009 = dma.done.wait [#allocation3], 80  }
 0x199   :  { %1010 = vsyncadd [#allocation3], 4294967216 }
 0x19a   :  { %950 = vsyncpa [#allocation3], 1 }

</bundles_post_ra>
